<compile_context>
chip_gen: v5e
topology: v5e:2x2
jax: 0.10.0
libtpu: 0.0.40
codegen_flags: <defaults>
</compile_context>

<pallas_src>
import jax
import jax.numpy as jnp
import numpy as np
from jax.experimental import pallas as pl
from jax.experimental.pallas import tpu as pltpu

HIDDEN = 128


def _round_up(n, m):
    return -(-n // m) * m


def dqn_kernel(x_ref, w1_ref, b1_ref, w2_ref, b2_ref, w3_ref, b3_ref, o_ref):
    # In-kernel bf16 cast of the native-width x tile (no wrapper pre-pass).
    x = x_ref[...].astype(jnp.bfloat16)
    # Layer 1: Linear(S, 128) + ReLU (bf16 operands, f32 accumulate on MXU).
    h1 = jnp.dot(x, w1_ref[...], preferred_element_type=jnp.float32)
    h1 = jnp.maximum(h1 + b1_ref[...], 0.0)
    # Layer 2: Linear(128, 128) + ReLU.
    h2 = jnp.dot(h1.astype(jnp.bfloat16), w2_ref[...],
                 preferred_element_type=jnp.float32)
    h2 = jnp.maximum(h2 + b2_ref[...], 0.0)
    # Layer 3: Linear(128, A) — no activation; store at true action width.
    out = jnp.dot(h2.astype(jnp.bfloat16), w3_ref[...],
                  preferred_element_type=jnp.float32)
    o_ref[...] = (out + b3_ref[...]).astype(o_ref.dtype)


def init_params(key, state_size, action_size, hidden=HIDDEN):
    """nn.Linear-style init U(-1/sqrt(fan_in), 1/sqrt(fan_in)).
    Weights stored transposed as (in, out); biases as (1, out). All f32."""
    ks = jax.random.split(key, 6)

    def linear(kw, kb, fan_in, fan_out):
        bound = 1.0 / np.sqrt(fan_in)
        w = jax.random.uniform(kw, (fan_in, fan_out), jnp.float32, -bound, bound)
        b = jax.random.uniform(kb, (1, fan_out), jnp.float32, -bound, bound)
        return w, b

    w1, b1 = linear(ks[0], ks[1], state_size, hidden)
    w2, b2 = linear(ks[2], ks[3], hidden, hidden)
    w3, b3 = linear(ks[4], ks[5], hidden, action_size)
    return {"w1": w1, "b1": b1, "w2": w2, "b2": b2, "w3": w3, "b3": b3}


def prepare_params(params):
    """One-time prep: cast weight matrices to bf16 (biases stay f32; the
    kernel accumulates in f32). No feature-dim padding anywhere."""
    return {
        "w1": params["w1"].astype(jnp.bfloat16), "b1": params["b1"],
        "w2": params["w2"].astype(jnp.bfloat16), "b2": params["b2"],
        "w3": params["w3"].astype(jnp.bfloat16), "b3": params["b3"],
        "state_size": params["w1"].shape[0],
        "action_size": params["w3"].shape[1],
    }


def _pick_batch_tile(B):
    """Choose (TB, B_pad). x stays f32, so sublane multiple of 8 suffices."""
    B8 = max(8, _round_up(B, 8))
    if B8 <= 512:
        # Small batch: one grid step, nothing worth sharding.
        return B8, B8
    # Large batch: big tiles amortize the ~0.35 us fixed per-grid-step cost.
    # Prefer a tile that divides B8 evenly (typical replay sizes 1024/2048/...)
    # while keeping >= 2 grid steps so v7x's two TensorCores both get work.
    for cand in (2048, 1024, 512):
        if B8 % cand == 0 and B8 // cand >= 2:
            return cand, B8
    tb = min(2048, _round_up(B8 // 2, 8))
    return tb, _round_up(B8, tb)


def dqn_forward(x, prep):
    """x: (B, state_size) f32. prep: output of prepare_params."""
    B, S = x.shape
    A = prep["action_size"]

    TB, B_pad = _pick_batch_tile(B)
    if B_pad != B:
        x = jnp.pad(x, ((0, B_pad - B), (0, 0)))

    grid = (B_pad // TB,)

    def resident(a):  # same block every grid step -> stays VMEM-resident
        return pl.BlockSpec(a.shape, lambda i: (0, 0))
    # TODO(synk): pipeline_mode=pl.Buffered(1) on resident specs would save
    # ~100 KiB of double-buffered VMEM; skipped as it is immaterial here.

    flops = 2 * B_pad * (S * HIDDEN + HIDDEN * HIDDEN + HIDDEN * A)
    bytes_accessed = (
        B_pad * S * 4                      # x read (f32, native width)
        + B_pad * A * 4                    # out write (f32, true action width)
        + sum(int(np.prod(prep[k].shape)) * prep[k].dtype.itemsize
              for k in ("w1", "b1", "w2", "b2", "w3", "b3"))
    )

    out = pl.pallas_call(
        dqn_kernel,
        out_shape=jax.ShapeDtypeStruct((B_pad, A), jnp.float32),
        grid=grid,
        in_specs=[
            pl.BlockSpec((TB, S), lambda i: (i, 0)),   # streamed activations
            resident(prep["w1"]), resident(prep["b1"]),
            resident(prep["w2"]), resident(prep["b2"]),
            resident(prep["w3"]), resident(prep["b3"]),
        ],
        out_specs=pl.BlockSpec((TB, A), lambda i: (i, 0)),
        compiler_params=pltpu.CompilerParams(dimension_semantics=("parallel",)),
        cost_estimate=pl.CostEstimate(flops=flops, transcendentals=0,
                                      bytes_accessed=bytes_accessed),
    )(x, prep["w1"], prep["b1"], prep["w2"], prep["b2"], prep["w3"], prep["b3"])

    return out[:B] if B_pad != B else out


def dqn_reference(x, p):
    h1 = jnp.maximum(x @ p["w1"] + p["b1"], 0.0)
    h2 = jnp.maximum(h1 @ p["w2"] + p["b2"], 0.0)
    return h2 @ p["w3"] + p["b3"]


if __name__ == "__main__":
    key = jax.random.PRNGKey(0)
    k_param, k_x1, k_x2 = jax.random.split(key, 3)

    batch, state_size, action_size = 2, 8, 4
    params = init_params(k_param, state_size, action_size)
    prep = prepare_params(params)

    # Small-batch case (single grid step).
    x = jax.random.normal(k_x1, (batch, state_size), jnp.float32)
    out = jax.block_until_ready(dqn_forward(x, prep))
    ref = dqn_reference(x, params)
    # bf16 matmul operands (f32 accumulate) -> loosened tolerance.
    np.testing.assert_allclose(np.asarray(out), np.asarray(ref), rtol=3e-2, atol=3e-2)

    # Larger batch to exercise the multi-step parallel grid + batch padding.
    x_big = jax.random.normal(k_x2, (1040, state_size), jnp.float32)
    out_big = jax.block_until_ready(dqn_forward(x_big, prep))
    ref_big = dqn_reference(x_big, params)
    np.testing.assert_allclose(np.asarray(out_big), np.asarray(ref_big),
                               rtol=3e-2, atol=3e-2)

    print("KERNEL_OK")
</pallas_src>

<mosaic_0001>
module attributes {stable_mosaic.version = 11 : i64} {
  func.func @dqn_kernel(%arg0: i32, %arg1: memref<8x8xf32, #tpu.memory_space<vmem>>, %arg2: memref<8x128xbf16, #tpu.memory_space<vmem>>, %arg3: memref<1x128xf32, #tpu.memory_space<vmem>>, %arg4: memref<128x128xbf16, #tpu.memory_space<vmem>>, %arg5: memref<1x128xf32, #tpu.memory_space<vmem>>, %arg6: memref<128x4xbf16, #tpu.memory_space<vmem>>, %arg7: memref<1x4xf32, #tpu.memory_space<vmem>>, %arg8: memref<8x4xf32, #tpu.memory_space<vmem>>) attributes {dimension_semantics = [#tpu.dimension_semantics<parallel>], iteration_bounds = array<i64: 1>, scalar_prefetch = 0 : i64, scratch_operands = 0 : i64, tpu.core_type = #tpu.core_type<tc>, window_params = [{transform_indices = @transform_0, window_bounds = array<i64: 8, 8>}, {pipeline_mode = #tpu.pipeline_mode<synchronous>, transform_indices = @transform_1, window_bounds = array<i64: 8, 128>}, {pipeline_mode = #tpu.pipeline_mode<synchronous>, transform_indices = @transform_2, window_bounds = array<i64: 1, 128>}, {pipeline_mode = #tpu.pipeline_mode<synchronous>, transform_indices = @transform_3, window_bounds = array<i64: 128, 128>}, {pipeline_mode = #tpu.pipeline_mode<synchronous>, transform_indices = @transform_4, window_bounds = array<i64: 1, 128>}, {pipeline_mode = #tpu.pipeline_mode<synchronous>, transform_indices = @transform_5, window_bounds = array<i64: 128, 4>}, {pipeline_mode = #tpu.pipeline_mode<synchronous>, transform_indices = @transform_6, window_bounds = array<i64: 1, 4>}, {transform_indices = @transform_7, window_bounds = array<i64: 8, 4>}]} {
    %c0 = arith.constant 0 : index
    %c0_0 = arith.constant 0 : index
    %0 = vector.load %arg1[%c0, %c0_0] : memref<8x8xf32, #tpu.memory_space<vmem>>, vector<8x8xf32>
    %1 = arith.truncf %0 : vector<8x8xf32> to vector<8x8xbf16>
    %c0_1 = arith.constant 0 : index
    %c0_2 = arith.constant 0 : index
    %2 = vector.load %arg2[%c0_1, %c0_2] : memref<8x128xbf16, #tpu.memory_space<vmem>>, vector<8x128xbf16>
    %cst = arith.constant dense<0.000000e+00> : vector<8x128xf32>
    %3 = tpu.matmul %1, %2, %cst {dimension_numbers = #tpu.dot_dimension_numbers<[1], [0], [0], [1], [0, 0, 1, 1], [], []>} : vector<8x8xbf16>, vector<8x128xbf16>, vector<8x128xf32> -> vector<8x128xf32>
    %c0_3 = arith.constant 0 : index
    %c0_4 = arith.constant 0 : index
    %4 = vector.load %arg3[%c0_3, %c0_4] : memref<1x128xf32, #tpu.memory_space<vmem>>, vector<1x128xf32>
    %5 = vector.broadcast %4 : vector<1x128xf32> to vector<8x128xf32>
    %6 = arith.addf %3, %5 : vector<8x128xf32>
    %cst_5 = arith.constant 0.000000e+00 : f32
    %7 = vector.broadcast %cst_5 : f32 to vector<8x128xf32>
    %8 = arith.maximumf %6, %7 : vector<8x128xf32>
    %9 = arith.truncf %8 : vector<8x128xf32> to vector<8x128xbf16>
    %c0_6 = arith.constant 0 : index
    %c0_7 = arith.constant 0 : index
    %10 = vector.load %arg4[%c0_6, %c0_7] : memref<128x128xbf16, #tpu.memory_space<vmem>>, vector<128x128xbf16>
    %cst_8 = arith.constant dense<0.000000e+00> : vector<8x128xf32>
    %11 = tpu.matmul %9, %10, %cst_8 {dimension_numbers = #tpu.dot_dimension_numbers<[1], [0], [0], [1], [0, 0, 1, 1], [], []>} : vector<8x128xbf16>, vector<128x128xbf16>, vector<8x128xf32> -> vector<8x128xf32>
    %c0_9 = arith.constant 0 : index
    %c0_10 = arith.constant 0 : index
    %12 = vector.load %arg5[%c0_9, %c0_10] : memref<1x128xf32, #tpu.memory_space<vmem>>, vector<1x128xf32>
    %13 = vector.broadcast %12 : vector<1x128xf32> to vector<8x128xf32>
    %14 = arith.addf %11, %13 : vector<8x128xf32>
    %cst_11 = arith.constant 0.000000e+00 : f32
    %15 = vector.broadcast %cst_11 : f32 to vector<8x128xf32>
    %16 = arith.maximumf %14, %15 : vector<8x128xf32>
    %17 = arith.truncf %16 : vector<8x128xf32> to vector<8x128xbf16>
    %c0_12 = arith.constant 0 : index
    %c0_13 = arith.constant 0 : index
    %18 = vector.load %arg6[%c0_12, %c0_13] : memref<128x4xbf16, #tpu.memory_space<vmem>>, vector<128x4xbf16>
    %cst_14 = arith.constant dense<0.000000e+00> : vector<8x4xf32>
    %19 = tpu.matmul %17, %18, %cst_14 {dimension_numbers = #tpu.dot_dimension_numbers<[1], [0], [0], [1], [0, 0, 1, 1], [], []>} : vector<8x128xbf16>, vector<128x4xbf16>, vector<8x4xf32> -> vector<8x4xf32>
    %c0_15 = arith.constant 0 : index
    %c0_16 = arith.constant 0 : index
    %20 = vector.load %arg7[%c0_15, %c0_16] : memref<1x4xf32, #tpu.memory_space<vmem>>, vector<1x4xf32>
    %21 = vector.broadcast %20 : vector<1x4xf32> to vector<8x4xf32>
    %22 = arith.addf %19, %21 : vector<8x4xf32>
    %c0_17 = arith.constant 0 : index
    %c0_18 = arith.constant 0 : index
    %23 = vector.load %arg8[%c0_17, %c0_18] : memref<8x4xf32, #tpu.memory_space<vmem>>, vector<8x4xf32>
    tpu.vector_store %arg8[%c0_17, %c0_18], %22 {strides = array<i32>} : memref<8x4xf32, #tpu.memory_space<vmem>>, vector<8x4xf32>,
    return
  }
  func.func @transform_0(%arg0: i32) -> (i32, i32) {
    %c0_i32 = arith.constant 0 : i32
    %c0_i32_0 = arith.constant 0 : i32
    return %arg0, %c0_i32 : i32, i32
  }
  func.func @transform_1(%arg0: i32) -> (i32, i32) {
    %c0_i32 = arith.constant 0 : i32
    %c0_i32_0 = arith.constant 0 : i32
    %c0_i32_1 = arith.constant 0 : i32
    return %c0_i32, %c0_i32_0 : i32, i32
  }
  func.func @transform_2(%arg0: i32) -> (i32, i32) {
    %c0_i32 = arith.constant 0 : i32
    %c0_i32_0 = arith.constant 0 : i32
    %c0_i32_1 = arith.constant 0 : i32
    return %c0_i32, %c0_i32_0 : i32, i32
  }
  func.func @transform_3(%arg0: i32) -> (i32, i32) {
    %c0_i32 = arith.constant 0 : i32
    %c0_i32_0 = arith.constant 0 : i32
    %c0_i32_1 = arith.constant 0 : i32
    return %c0_i32, %c0_i32_0 : i32, i32
  }
  func.func @transform_4(%arg0: i32) -> (i32, i32) {
    %c0_i32 = arith.constant 0 : i32
    %c0_i32_0 = arith.constant 0 : i32
    %c0_i32_1 = arith.constant 0 : i32
    return %c0_i32, %c0_i32_0 : i32, i32
  }
  func.func @transform_5(%arg0: i32) -> (i32, i32) {
    %c0_i32 = arith.constant 0 : i32
    %c0_i32_0 = arith.constant 0 : i32
    %c0_i32_1 = arith.constant 0 : i32
    return %c0_i32, %c0_i32_0 : i32, i32
  }
  func.func @transform_6(%arg0: i32) -> (i32, i32) {
    %c0_i32 = arith.constant 0 : i32
    %c0_i32_0 = arith.constant 0 : i32
    %c0_i32_1 = arith.constant 0 : i32
    return %c0_i32, %c0_i32_0 : i32, i32
  }
  func.func @transform_7(%arg0: i32) -> (i32, i32) {
    %c0_i32 = arith.constant 0 : i32
    %c0_i32_0 = arith.constant 0 : i32
    return %arg0, %c0_i32 : i32, i32
  }
}

</mosaic_0001>

<bundles_post_ra>
// kernel: tpu_custom_call.1
= control target key start
LH: loop header
LB: loop body
LE: loop exit
PB: predicated region body
PF: predicated region fallthrough
CT: control target
= control target key end

     0   :  { %12 = vsyncpa [#allocation3], 0  ;;  %s542_s0 = inlined_call_operand.hbm [shape: f32[8,8], index: 0, kind: input, shape index: {}]   ;;  %s543_s1 = inlined_call_operand.vmem [shape: bf16[8,128], index: 1, kind: input, shape index: {}]   ;;  %s544_s2 = inlined_call_operand.hbm [shape: f32[1,128], index: 2, kind: input, shape index: {}]   ;;  %s545_s3 = inlined_call_operand.vmem [shape: bf16[128,128], index: 3, kind: input, shape index: {}]   ;;  %s546_s4 = inlined_call_operand.hbm [shape: f32[1,128], index: 4, kind: input, shape index: {}]   ;;  %s547_s5 = inlined_call_operand.vmem [shape: bf16[128,4], index: 5, kind: input, shape index: {}]   ;;  %s548_s6 = inlined_call_operand.vmem [shape: f32[1,4], index: 6, kind: input, shape index: {}]   ;;  %s549_s7 = inlined_call_operand.vmem [shape: f32[8,4], index: 7, kind: output, shape index: {}]  }
   0x1   :  { %13 = vsyncpa [#allocation5], 0  ;;  %s32_s26 = sshll.u32 %s544_s2, 4  ;;  %s433_s27 = smov [#allocation4]   ;;  %s33_s26 = int_to_ptr.hbm [resolvable:$true] %s32_s26 }
   0x2   :  { %s34_s28 = sshll.u32 %s433_s27, 4  ;;  %s19_s8 = sshll.u32 %s542_s0, 4  ;;  %s35_s28 = int_to_ptr.vmem [resolvable:$true] %s34_s28  ;;  %s20_s8 = int_to_ptr.hbm [resolvable:$true] %s19_s8 }
   0x3   :  { %37 = dma.hbm_to_vmem [thread:$0]  %s33_s26, 16, %s35_s28, [#allocation5]  }
   0x4   :  { %s434_s9 = smov [#allocation2]   ;;  %s45_s13 = sshll.u32 %s546_s4, 4  ;;  %s46_s13 = int_to_ptr.hbm [resolvable:$true] %s45_s13 }
   0x5   :  { %s21_s10 = sshll.u32 %s434_s9, 4  ;;  %s435_s2 = smov [#allocation6]   ;;  %s22_s10 = int_to_ptr.vmem [resolvable:$true] %s21_s10 }
   0x6   :  { %24 = dma.hbm_to_vmem [thread:$0]  %s20_s8, 128, %s22_s10, [#allocation3]  }
   0x7   :  { %s47_s14 = sshll.u32 %s435_s2, 4  ;;  %s48_s14 = int_to_ptr.vmem [resolvable:$true] %s47_s14 }
   0x8   :  { %50 = dma.hbm_to_vmem [thread:$0]  %s46_s13, 16, %s48_s14, [#allocation5]  }
   0x9   :  { %429 = dma.done.wait [#allocation3], 128  }
   0xa   :  { %430 = vsyncadd [#allocation3], 4294967168 }
   0xb   :  { %431 = dma.done.wait [#allocation5], 32  }
   0xc   :  { %432 = vsyncadd [#allocation5], 4294967264  ;;  %vm79_vm0 = vcmask 1043456   ;;  %v70_v0 = vld [vmem:[%s543_s1] sm:$0xf]  ;;  %v342_v2 = vld [vmem:[%s545_s3 + $0x38] sm:$0xff] }
   0xd   :  { %v68_v1 = vld [vmem:[#allocation2] sm:$0xff]  ;;  %v81_v3 = vsel %vm79_vm0, %v70_v0, 0  ;;  %vm75_vm1 = vcmask 64512   ;;  %166 = vmatpush.bf16.msra.mxu1 %v342_v2  ;;  %v341_v5 = vld [vmem:[%s545_s3 + $0x30] sm:$0xff]  ;;  %v340_v6 = vld [vmem:[%s545_s3 + $0x28] sm:$0xff]  ;;  %vm262_vm2 = vcmask 31744  }
   0xe   :  { %v69_v4 = vpack.c.bf16 %v68_v1, %v68_v1  ;;  %90 = vmatpush.bf16.msra.mxu0 %v81_v3  ;;  %v339_v7 = vld [vmem:[%s545_s3 + $0x20] sm:$0xff]  ;;  %v338_v8 = vld [vmem:[%s545_s3 + $0x18] sm:$0xff]  ;;  %v337_v9 = vld [vmem:[%s545_s3 + $0x10] sm:$0xff] }
   0xf   :  { %v336_v10 = vld [vmem:[%s545_s3 + $0x8] sm:$0xff]  ;;  %v335_v11 = vld [vmem:[%s545_s3] sm:$0xff]  ;;  %v350_v12 = vld [vmem:[%s547_s5 + $0x38] sm:$0xff] }
  0x10   :  { %249 = vmatpush.bf16.msra.mxu2 %v350_v12  ;;  %v349_v13 = vld [vmem:[%s547_s5 + $0x30] sm:$0xff]  ;;  %v348_v14 = vld [vmem:[%s547_s5 + $0x28] sm:$0xff]  ;;  %v347_v15 = vld [vmem:[%s547_s5 + $0x20] sm:$0xff] }
  0x11   :  { %270 = vmatmul.msk.bf16.vlgmr.msra.gmra.mxu0 %vm75_vm1, %v69_v4  ;;  %167 = vmatpush.bf16.msra.mxu1 %v341_v5  ;;  %v346_v16 = vld [vmem:[%s547_s5 + $0x18] sm:$0xff]  ;;  %v345_v17 = vld [vmem:[%s547_s5 + $0x10] sm:$0xff]  ;;  %v354_v18 = vld [vmem:[#allocation4] ss:$0 sm:$0xff] }
  0x12   :  { %v344_v24 = vld [vmem:[%s547_s5 + $0x8] sm:$0xff]  ;;  %v343_v25 = vld [vmem:[%s547_s5] sm:$0xff] }
  0x13   :  { %v355_v26 = vld [vmem:[#allocation6] ss:$0 sm:$0xff]  ;;  %v356_v32 = vld [vmem:[%s548_s6] ss:$0 sm:$0xff] }
  0x14   :  { %250 = vmatpush.bf16.msra.mxu2 %v349_v13 }
  0x15   :  { %168 = vmatpush.bf16.msra.mxu1 %v340_v6 }
  0x18   :  { %251 = vmatpush.bf16.msra.mxu2 %v348_v14 }
  0x19   :  { %169 = vmatpush.bf16.msra.mxu1 %v339_v7 }
  0x1c   :  { %252 = vmatpush.bf16.msra.mxu2 %v347_v15 }
  0x1d   :  { %170 = vmatpush.bf16.msra.mxu1 %v338_v8 }
  0x20   :  { %253 = vmatpush.bf16.msra.mxu2 %v346_v16 }
  0x21   :  { %171 = vmatpush.bf16.msra.mxu1 %v337_v9 }
  0x24   :  { %254 = vmatpush.bf16.msra.mxu2 %v345_v17 }
  0x25   :  { %172 = vmatpush.bf16.msra.mxu1 %v336_v10 }
  0x28   :  { %255 = vmatpush.bf16.msra.mxu2 %v344_v24 }
  0x29   :  { %173 = vmatpush.bf16.msra.mxu1 %v335_v11 }
  0x2c   :  { %256 = vmatpush.bf16.msra.mxu2 %v343_v25 }
  0x8e   :  { %v92_v19 = vpop.f32.mrf.mxu0 }
  0x8f   :  { %v93_v20 = vadd.f32 %v354_v18, %v92_v19 }
  0x91   :  { %v96_v21 = vmax.f32 %v93_v20, 0.0 }
  0x93   :  { %v97_v22 = vpack.c.bf16 %v96_v21, %v96_v21 }
  0x95   :  { %174 = vmatmul.bf16.vlgmr.msra.gmra.mxu1 %v97_v22 }
  0x96   :  { %v94_v23 = vpop.f32.mrf.mxu0 }
 0x112   :  { %v175_v27 = vpop.f32.mrf.mxu1 }
 0x113   :  { %v176_v28 = vadd.f32 %v355_v26, %v175_v27 }
 0x115   :  { %v179_v29 = vmax.f32 %v176_v28, 0.0 }
 0x117   :  { %v180_v30 = vpack.c.bf16 %v179_v29, %v179_v29 }
 0x119   :  { %257 = vmatmul.bf16.vlgmr.msra.gmra.mxu2 %v180_v30 }
 0x11a   :  { %v177_v31 = vpop.f32.mrf.mxu1 }
 0x19c   :  { %v258_v33 = vpop.f32.mrf.mxu2 }
 0x19d   :  { %v259_v34 = vadd.f32 %v356_v32, %v258_v33 }
 0x19f   :  { %263 = vst.msk [vmem:[%s549_s7] sm:$0xff] %vm262_vm2, %v259_v34 }
 0x1a4   :  { %v260_v35 = vpop.f32.mrf.mxu2 }
 0x1a5   :  { %268 = vsyncpa [#allocation3], 1 }
 0x1a6   :  { %269 = vsyncpa [#allocation5], 1 }

</bundles_post_ra>
